<compile_context>
chip_gen: v5e
topology: v5e:2x2
jax: 0.10.0
libtpu: 0.0.40
codegen_flags: <defaults>
</compile_context>

<pallas_src>
import functools

import jax
import jax.numpy as jnp
from jax.experimental import pallas as pl
from jax.experimental.pallas import tpu as pltpu


def _round_up(x, m):
    return ((x + m - 1) // m) * m


def _thin_kernel(x_ref, u_ref, vt_ref, b_ref, o_ref):
    # x_ref:  (tm, in_f)  x's HBM dtype     u_ref:  (in_f, rank_pad) compute dtype
    # vt_ref: (rank_pad, out_f) compute dt  b_ref:  (1, out_f) f32
    # o_ref:  (tm, out_f) x's dtype
    xt = x_ref[...].astype(u_ref.dtype)            # in-kernel cast (hidden under DMA)
    t = jnp.dot(xt, u_ref[...], preferred_element_type=jnp.float32)
    out = jnp.dot(t.astype(vt_ref.dtype), vt_ref[...],
                  preferred_element_type=jnp.float32)
    out = out + b_ref[...]                          # bias add in f32
    o_ref[...] = out.astype(o_ref.dtype)


def _tpu_vmem_bytes():
    try:
        return int(pltpu.get_tpu_info().vmem_capacity_bytes)
    except Exception:
        return 64 << 20  # conservative fallback (v7x per-core VMEM)


def _num_tensorcores():
    try:
        kind = jax.devices()[0].device_kind.lower()
        if "v7" in kind:
            return 2
    except Exception:
        pass
    return 1


def _resident_spec(shape):
    """Constant-index (resident) weight block; single-buffered when supported."""
    try:
        return pl.BlockSpec(shape, lambda i: (0, 0), pipeline_mode=pl.Buffered(1))
    except (TypeError, AttributeError):
        return pl.BlockSpec(shape, lambda i: (0, 0))


def _pick_tile_m(M, in_f, out_f, rank_pad, x_itemsize, w_itemsize, out_itemsize,
                 tm_request, vmem_cap, num_cores):
    """Pick the row tile and vmem limit from a generation-aware VMEM budget."""
    budget_total = min(vmem_cap - (8 << 20), int(0.80 * vmem_cap))
    # Resident (single-buffered) weights + f32 bias.
    weight_bytes = (in_f * rank_pad + rank_pad * out_f) * w_itemsize + out_f * 4
    # Per-row bytes: double-buffered x / out tiles + in-kernel temporaries
    # (compute-dtype x tile, f32 t, compute-dtype t, f32 pre-store out).
    per_row = (2 * (in_f * x_itemsize + out_f * out_itemsize)
               + in_f * w_itemsize
               + rank_pad * (4 + w_itemsize)
               + out_f * 4)
    budget_rows = budget_total - weight_bytes
    if budget_rows < 8 * per_row:
        # TODO(synk): split the K (in_f) and/or N (out_f) axes with an f32
        # accumulator scratch + pl.when when the resident weights alone exceed VMEM.
        raise ValueError(
            "ThinLinear weights too large for single-pass VMEM residency: need "
            f"{weight_bytes + 8 * per_row} B, budget {budget_total} B.")

    tm = max(8, min(_round_up(tm_request, 8), _round_up(M, 8)))
    if num_cores > 1:
        # >= 2*num_cores (balanced) grid steps so both TensorCores get work.
        tm = min(tm, max(8, _round_up(pl.cdiv(M, 2 * num_cores), 8)))
    while tm > 8 and tm * per_row > budget_rows:
        tm = max(8, _round_up(tm // 2, 8))

    need = weight_bytes + tm * per_row
    vmem_limit = int(min(max(int(1.3 * need), 32 << 20), vmem_cap - (8 << 20)))
    return tm, vmem_limit


@functools.partial(jax.jit, static_argnames=("tm", "compute_dtype"))
def thin_linear(x, U, S, V, b=None, *, tm=1024, compute_dtype=None):
    """y = ((x @ U) @ S) @ V.T + b   with x: [B, T, in_features].

    compute_dtype (e.g. jnp.bfloat16) sets the weight / MXU dtype; the x tile
    is cast in-kernel, so an f32 x is never re-written to HBM.  To also halve
    the x streaming bytes (the big win on v5e), pass x already as bfloat16.
    """
    B, T, in_features = x.shape
    out_features, rank = V.shape
    M = B * T

    cdt = jnp.dtype(compute_dtype) if compute_dtype is not None else jnp.dtype(x.dtype)
    w_itemsize = cdt.itemsize
    x_itemsize = jnp.dtype(x.dtype).itemsize
    out_itemsize = x_itemsize

    # Fold S into U exactly (tiny matmul; valid for any S) and pre-transpose V
    # to a lane-dense (rank, out) layout.  Only the tiny weights get padded:
    # rank is rounded up to 128 for aligned layouts; in/out stay exact so x and
    # y need no wrapper-side pad / slice passes.
    Us = U @ S                                     # (in_features, rank)
    Vt = V.T                                       # (rank, out_features)
    rank_pad = _round_up(rank, 128)
    Us_p = jnp.pad(Us.astype(cdt), ((0, 0), (0, rank_pad - rank)))
    Vt_p = jnp.pad(Vt.astype(cdt), ((0, rank_pad - rank), (0, 0)))
    if b is None:
        b2 = jnp.zeros((1, out_features), jnp.float32)
    else:
        b2 = b.astype(jnp.float32).reshape(1, out_features)

    vmem_cap = _tpu_vmem_bytes()
    num_cores = _num_tensorcores()
    tm_eff, vmem_limit = _pick_tile_m(
        M, in_features, out_features, rank_pad, x_itemsize, w_itemsize,
        out_itemsize, tm, vmem_cap, num_cores)
    grid_m = pl.cdiv(M, tm_eff)

    x2 = x.reshape(M, in_features)                 # view-only reshape, no cast/pad

    cost = pl.CostEstimate(
        flops=2 * M * rank_pad * (in_features + out_features),
        transcendentals=0,
        bytes_accessed=(M * in_features * x_itemsize
                        + M * out_features * out_itemsize
                        + (in_features * rank_pad
                           + rank_pad * out_features) * w_itemsize
                        + out_features * 4),
    )

    out2 = pl.pallas_call(
        _thin_kernel,
        out_shape=jax.ShapeDtypeStruct((M, out_features), x.dtype),
        grid_spec=pltpu.PrefetchScalarGridSpec(
            num_scalar_prefetch=0,
            grid=(grid_m,),
            in_specs=[
                pl.BlockSpec((tm_eff, in_features), lambda i: (i, 0)),
                _resident_spec((in_features, rank_pad)),
                _resident_spec((rank_pad, out_features)),
                _resident_spec((1, out_features)),
            ],
            out_specs=pl.BlockSpec((tm_eff, out_features), lambda i: (i, 0)),
        ),
        compiler_params=pltpu.CompilerParams(
            dimension_semantics=("parallel",),
            vmem_limit_bytes=vmem_limit),
        cost_estimate=cost,
    )(x2, Us_p, Vt_p, b2)

    # TODO(synk): for out_features large enough that tm*out*4 dominates VMEM,
    # add an N grid axis (block Vt / output over tn) with t cached in a VMEM
    # scratch under pl.when(j == 0).
    return out2.reshape(B, T, out_features)


def _orthogonal(key, rows, cols, dtype=jnp.float32):
    # Deterministic orthogonal init (equivalent in spirit to nn.init.orthogonal_).
    a = jax.random.normal(key, (max(rows, cols), min(rows, cols)), dtype)
    q, r = jnp.linalg.qr(a)
    q = q * jnp.sign(jnp.diagonal(r))  # canonical sign
    if rows < cols:
        q = q.T
    return q[:rows, :cols].astype(dtype)


def init_thin_linear_params(key, in_features, out_features, rank, bias=True):
    ku, kv, ks = jax.random.split(key, 3)
    U = _orthogonal(ku, in_features, rank)                 # (in_features, rank)
    V = _orthogonal(kv, out_features, rank)                # (out_features, rank)
    s = jax.random.uniform(ks, (rank,), jnp.float32, 0.01, 0.1)
    S = jnp.diag(s)                                        # (rank, rank)
    b = jnp.zeros((out_features,), jnp.float32) if bias else None
    return U, S, V, b


if __name__ == "__main__":
    # Small shapes consistent with the module: 3-D input [B, T, in_features].
    B, T = 2, 8
    in_features, out_features, rank = 32, 32, 8

    root = jax.random.PRNGKey(0)
    kx, kp = jax.random.split(root)
    x = jax.random.normal(kx, (B, T, in_features), jnp.float32)
    U, S, V, b = init_thin_linear_params(kp, in_features, out_features, rank,
                                         bias=True)

    y_ref = ((x @ U) @ S) @ V.T + b

    # f32 path (default): must match the reference tightly.
    y = thin_linear(x, U, S, V, b)
    y = jax.block_until_ready(y)
    assert y.shape == (B, T, out_features)
    assert jnp.allclose(y, y_ref, atol=1e-5, rtol=1e-5), "mismatch vs reference"

    # bf16 compute path for the HBM-bound regime (loose tolerance).
    y_bf16 = thin_linear(x, U, S, V, b, compute_dtype=jnp.bfloat16)
    y_bf16 = jax.block_until_ready(y_bf16)
    assert jnp.allclose(y_bf16, y_ref, atol=1e-1, rtol=1e-1), "bf16 path mismatch"

    # No-bias path.
    y_nb = thin_linear(x, U, S, V, None)
    y_nb = jax.block_until_ready(y_nb)
    assert jnp.allclose(y_nb, ((x @ U) @ S) @ V.T, atol=1e-5, rtol=1e-5)

    print("KERNEL_OK")
</pallas_src>

<mosaic_0001>
module attributes {stable_mosaic.version = 11 : i64} {
  func.func @_thin_kernel(%arg0: i32, %arg1: memref<16x32xf32, #tpu.memory_space<vmem>>, %arg2: memref<32x128xf32, #tpu.memory_space<vmem>>, %arg3: memref<128x32xf32, #tpu.memory_space<vmem>>, %arg4: memref<1x32xf32, #tpu.memory_space<vmem>>, %arg5: memref<16x32xf32, #tpu.memory_space<vmem>>) attributes {dimension_semantics = [#tpu.dimension_semantics<parallel>], iteration_bounds = array<i64: 1>, scalar_prefetch = 0 : i64, scratch_operands = 0 : i64, tpu.core_type = #tpu.core_type<tc>, window_params = [{transform_indices = @transform_0, window_bounds = array<i64: 16, 32>}, {pipeline_mode = #tpu.pipeline_mode<synchronous>, transform_indices = @transform_1, window_bounds = array<i64: 32, 128>}, {pipeline_mode = #tpu.pipeline_mode<synchronous>, transform_indices = @transform_2, window_bounds = array<i64: 128, 32>}, {pipeline_mode = #tpu.pipeline_mode<synchronous>, transform_indices = @transform_3, window_bounds = array<i64: 1, 32>}, {transform_indices = @transform_4, window_bounds = array<i64: 16, 32>}]} {
    %c0 = arith.constant 0 : index
    %c0_0 = arith.constant 0 : index
    %0 = vector.load %arg1[%c0, %c0_0] : memref<16x32xf32, #tpu.memory_space<vmem>>, vector<16x32xf32>
    %c0_1 = arith.constant 0 : index
    %c0_2 = arith.constant 0 : index
    %1 = vector.load %arg2[%c0_1, %c0_2] : memref<32x128xf32, #tpu.memory_space<vmem>>, vector<32x128xf32>
    %cst = arith.constant dense<0.000000e+00> : vector<16x128xf32>
    %2 = tpu.matmul %0, %1, %cst {dimension_numbers = #tpu.dot_dimension_numbers<[1], [0], [0], [1], [0, 0, 1, 1], [], []>} : vector<16x32xf32>, vector<32x128xf32>, vector<16x128xf32> -> vector<16x128xf32>
    %c0_3 = arith.constant 0 : index
    %c0_4 = arith.constant 0 : index
    %3 = vector.load %arg3[%c0_3, %c0_4] : memref<128x32xf32, #tpu.memory_space<vmem>>, vector<128x32xf32>
    %cst_5 = arith.constant dense<0.000000e+00> : vector<16x32xf32>
    %4 = tpu.matmul %2, %3, %cst_5 {dimension_numbers = #tpu.dot_dimension_numbers<[1], [0], [0], [1], [0, 0, 1, 1], [], []>} : vector<16x128xf32>, vector<128x32xf32>, vector<16x32xf32> -> vector<16x32xf32>
    %c0_6 = arith.constant 0 : index
    %c0_7 = arith.constant 0 : index
    %5 = vector.load %arg4[%c0_6, %c0_7] : memref<1x32xf32, #tpu.memory_space<vmem>>, vector<1x32xf32>
    %6 = vector.broadcast %5 : vector<1x32xf32> to vector<16x32xf32>
    %7 = arith.addf %4, %6 : vector<16x32xf32>
    %c0_8 = arith.constant 0 : index
    %c0_9 = arith.constant 0 : index
    %8 = vector.load %arg5[%c0_8, %c0_9] : memref<16x32xf32, #tpu.memory_space<vmem>>, vector<16x32xf32>
    tpu.vector_store %arg5[%c0_8, %c0_9], %7 {strides = array<i32>} : memref<16x32xf32, #tpu.memory_space<vmem>>, vector<16x32xf32>,
    return
  }
  func.func @transform_0(%arg0: i32) -> (i32, i32) {
    %c0_i32 = arith.constant 0 : i32
    %c0_i32_0 = arith.constant 0 : i32
    return %arg0, %c0_i32 : i32, i32
  }
  func.func @transform_1(%arg0: i32) -> (i32, i32) {
    %c0_i32 = arith.constant 0 : i32
    %c0_i32_0 = arith.constant 0 : i32
    %c0_i32_1 = arith.constant 0 : i32
    return %c0_i32, %c0_i32_0 : i32, i32
  }
  func.func @transform_2(%arg0: i32) -> (i32, i32) {
    %c0_i32 = arith.constant 0 : i32
    %c0_i32_0 = arith.constant 0 : i32
    %c0_i32_1 = arith.constant 0 : i32
    return %c0_i32, %c0_i32_0 : i32, i32
  }
  func.func @transform_3(%arg0: i32) -> (i32, i32) {
    %c0_i32 = arith.constant 0 : i32
    %c0_i32_0 = arith.constant 0 : i32
    %c0_i32_1 = arith.constant 0 : i32
    return %c0_i32, %c0_i32_0 : i32, i32
  }
  func.func @transform_4(%arg0: i32) -> (i32, i32) {
    %c0_i32 = arith.constant 0 : i32
    %c0_i32_0 = arith.constant 0 : i32
    return %arg0, %c0_i32 : i32, i32
  }
}

</mosaic_0001>

<bundles_post_ra>
// kernel: thin_linear.1
= control target key start
LH: loop header
LB: loop body
LE: loop exit
PB: predicated region body
PF: predicated region fallthrough
CT: control target
= control target key end

     0   :  { %vm24_vm0 = vcmask 261120   ;;  %s269_s0 = inlined_call_operand.vmem [shape: f32[16,32], index: 0, kind: input, shape index: {}]   ;;  %s270_s1 = inlined_call_operand.vmem [shape: f32[32,128], index: 1, kind: input, shape index: {}]   ;;  %s271_s2 = inlined_call_operand.vmem [shape: f32[128,32], index: 2, kind: input, shape index: {}]   ;;  %s272_s3 = inlined_call_operand.vmem [shape: f32[1,32], index: 3, kind: input, shape index: {}]   ;;  %s273_s4 = inlined_call_operand.hbm [shape: f32[16,32], index: 4, kind: output, shape index: {}]  }
   0x1   :  { %v23_v0 = vld [vmem:[%s270_s1 + $0x18] sm:$0xff]  ;;  %v22_v1 = vld [vmem:[%s270_s1 + $0x10] sm:$0xff]  ;;  %v21_v2 = vld [vmem:[%s270_s1 + $0x8] sm:$0xff] }
   0x2   :  { %43 = vmatpush.msra.mxu0 %v23_v0  ;;  %v69_v3 = vld [vmem:[%s271_s2 + $0x78] sm:$0xff]  ;;  %v68_v4 = vld [vmem:[%s271_s2 + $0x70] sm:$0xff]  ;;  %v20_v5 = vld [vmem:[%s270_s1] sm:$0xff] }
   0x3   :  { %74 = vmatpush.msra.mxu1 %v69_v3  ;;  %v67_v6 = vld [vmem:[%s271_s2 + $0x68] sm:$0xff]  ;;  %119 = vmatpush.msra.mxu2 %v69_v3  ;;  %v18_v7 = vld [vmem:[%s269_s0] sm:$0xff] }
   0x4   :  { %44 = vmatpush.msra.mxu0 %v22_v1  ;;  %v66_v8 = vld [vmem:[%s271_s2 + $0x60] sm:$0xff] }
   0x5   :  { %75 = vmatpush.msra.mxu1 %v68_v4  ;;  %120 = vmatpush.msra.mxu2 %v68_v4 }
   0x6   :  { %45 = vmatpush.msra.mxu0 %v21_v2 }
   0x7   :  { %76 = vmatpush.msra.mxu1 %v67_v6 }
   0x8   :  { %46 = vmatpush.msra.mxu0 %v20_v5 }
   0x9   :  { %9 = vsyncpa [#allocation3], 0  ;;  %117 = vmatmul.msk.f32.vlgmr.msra.gmra.mxu0 %vm24_vm0, %v18_v7  ;;  %v65_v9 = vld [vmem:[%s271_s2 + $0x58] sm:$0xff]  ;;  %121 = vmatpush.msra.mxu2 %v67_v6  ;;  %v64_v10 = vld [vmem:[%s271_s2 + $0x50] sm:$0xff]  ;;  %s165_s1 = smov [#allocation2]   ;;  %s166_s10 = smov 128  }
   0xa   :  { %77 = vmatpush.msra.mxu1 %v66_v8  ;;  %v63_v11 = vld [vmem:[%s271_s2 + $0x48] sm:$0xff]  ;;  %v62_v13 = vld [vmem:[%s271_s2 + $0x40] sm:$0xff]  ;;  %v61_v14 = vld [vmem:[%s271_s2 + $0x38] sm:$0xff]  ;;  %s103_s7 = sshll.u32 %s165_s1, 4  ;;  %s167_s11 = smov 8   ;;  %s104_s7 = int_to_ptr.vmem [resolvable:$true] %s103_s7 }
   0xb   :  { %122 = vmatpush.msra.mxu2 %v66_v8  ;;  %v19_v12 = vld [vmem:[%s269_s0 + $0x8] sm:$0xff]  ;;  %v60_v15 = vld [vmem:[%s271_s2 + $0x30] sm:$0xff]  ;;  %v58_v17 = vld [vmem:[%s271_s2 + $0x20] sm:$0xff] }
   0xc   :  { %78 = vmatpush.msra.mxu1 %v65_v9  ;;  %v59_v16 = vld [vmem:[%s271_s2 + $0x28] sm:$0xff]  ;;  %v57_v18 = vld [vmem:[%s271_s2 + $0x18] sm:$0xff]  ;;  %v56_v19 = vld [vmem:[%s271_s2 + $0x10] sm:$0xff] }
   0xd   :  { %123 = vmatpush.msra.mxu2 %v65_v9  ;;  %v55_v20 = vld [vmem:[%s271_s2 + $0x8] sm:$0xff]  ;;  %v54_v21 = vld [vmem:[%s271_s2] sm:$0xff]  ;;  %s105_s2 = sshll.u32 %s273_s4, 4  ;;  %s106_s2 = int_to_ptr.hbm [resolvable:$true] %s105_s2 }
   0xe   :  { %79 = vmatpush.msra.mxu1 %v64_v10  ;;  %v138_v24 = vld [vmem:[%s272_s3] ss:$0 sm:$0xff] }
   0xf   :  { %124 = vmatpush.msra.mxu2 %v64_v10 }
  0x10   :  { %80 = vmatpush.msra.mxu1 %v63_v11 }
  0x11   :  { %118 = vmatmul.msk.f32.gmra.mxu0 %vm24_vm0, %v19_v12  ;;  %125 = vmatpush.msra.mxu2 %v63_v11 }
  0x12   :  { %81 = vmatpush.msra.mxu1 %v62_v13 }
  0x13   :  { %126 = vmatpush.msra.mxu2 %v62_v13 }
  0x14   :  { %82 = vmatpush.msra.mxu1 %v61_v14 }
  0x15   :  { %127 = vmatpush.msra.mxu2 %v61_v14 }
  0x16   :  { %83 = vmatpush.msra.mxu1 %v60_v15 }
  0x17   :  { %128 = vmatpush.msra.mxu2 %v60_v15 }
  0x18   :  { %84 = vmatpush.msra.mxu1 %v59_v16 }
  0x19   :  { %129 = vmatpush.msra.mxu2 %v59_v16 }
  0x1a   :  { %85 = vmatpush.msra.mxu1 %v58_v17 }
  0x1b   :  { %130 = vmatpush.msra.mxu2 %v58_v17 }
  0x1c   :  { %86 = vmatpush.msra.mxu1 %v57_v18 }
  0x1d   :  { %131 = vmatpush.msra.mxu2 %v57_v18 }
  0x1e   :  { %87 = vmatpush.msra.mxu1 %v56_v19 }
  0x1f   :  { %132 = vmatpush.msra.mxu2 %v56_v19 }
  0x20   :  { %88 = vmatpush.msra.mxu1 %v55_v20 }
  0x21   :  { %133 = vmatpush.msra.mxu2 %v55_v20 }
  0x22   :  { %89 = vmatpush.msra.mxu1 %v54_v21 }
  0x23   :  { %134 = vmatpush.msra.mxu2 %v54_v21 }
  0x86   :  { %v48_v22 = vpop.f32.mrf.mxu0 }
  0x87   :  { %90 = vmatmul.f32.vlgmr.msra.gmra.mxu1 %v48_v22 }
  0x8e   :  { %v51_v23 = vpop.f32.mrf.mxu0 }
  0x8f   :  { %93 = vmatmul.f32.vlgmr.msra.gmra.mxu2 %v51_v23 }
 0x104   :  { %v91_v25 = vpop.f32.mrf.mxu1 }
 0x105   :  { %v92_v26 = vadd.f32 %v138_v24, %v91_v25 }
 0x107   :  { %97 = vst.msk [vmem:[#allocation2] sm:$0xff] %vm24_vm0, %v92_v26 }
 0x112   :  { %v94_v27 = vpop.f32.mrf.mxu2 }
 0x113   :  { %v95_v28 = vadd.f32 %v138_v24, %v94_v27 }
 0x115   :  { %98 = vst.msk [vmem:[#allocation2 + $0x8] sm:$0xff] %vm24_vm0, %v95_v28 }
 0x116   :  { %111 = dma.vmem_to_hbm [thread:$0]  %s104_s7, 256, %s106_s2, [#allocation3], %s166_s10, %s166_s10, %s167_s11  }
 0x117   :  { %163 = dma.done.wait [#allocation3], 256  }
 0x118   :  { %164 = vsyncadd [#allocation3], 4294967040 }
 0x119   :  { %116 = vsyncpa [#allocation3], 1 }

</bundles_post_ra>
